<compile_context>
chip_gen: v6e
topology: v6e:2x2x1
jax: 0.10.0
libtpu: 0.0.40
codegen_flags: <defaults>
</compile_context>

<pallas_src>
import functools

import jax
import jax.numpy as jnp
from jax.experimental import pallas as pl
from jax.experimental.pallas import tpu as pltpu


# ----------------------------- small helpers ---------------------------------

def _round_up(x, m):
    return ((x + m - 1) // m) * m


def _sublane_multiple(dtype):
    # Native sublane packing: f32 -> 8 rows/vreg, bf16 -> 16, int8/fp8 -> 32.
    return max(8, 32 // jnp.dtype(dtype).itemsize)


def _vmem_budget():
    """Generation-dependent (vmem_limit_bytes, tiling_budget_bytes)."""
    try:
        cap = pltpu.get_tpu_info().vmem_capacity_bytes
    except Exception:
        cap = 64 * 1024 * 1024                 # conservative default (v7x per-TC)
    vmem_limit = min(int(cap * 0.75), 100 * 1024 * 1024)   # ~48 MiB v7x, ~96 MiB v6e
    budget = int(vmem_limit * 0.75)
    return vmem_limit, budget


# ----------------------------- parameter folding ------------------------------
# Call ONCE (outside the per-step forward) and reuse the result: rebuilding the
# folded/transposed weights every call costs an extra weight-sized HBM round trip.

def fold_pointwise_params(w1, b1, w2=None, b2=None, *,
                          bn_scale=None, bn_shift=None, compute_dtype=None):
    """Fold eval-mode BatchNorm into lin1 and pre-transpose Conv1d(k=1) weights.

    w1, w2: (O, E) or (O, E, 1)   b1, b2: (O,)
    bn_scale/bn_shift: (E,) eval-mode scale/shift, or None when bn=False.
    """
    w1 = jnp.reshape(w1, (w1.shape[0], -1))
    O, E = w1.shape
    if compute_dtype is None:
        compute_dtype = w1.dtype
    w1f = w1.astype(jnp.float32)
    b1f = b1.reshape(O).astype(jnp.float32)
    if bn_scale is not None:
        scale = bn_scale.reshape(E).astype(jnp.float32)
        shift = bn_shift.reshape(E).astype(jnp.float32)
        # Exact fold: bn(x) @ W1^T + b1 == x @ (W1*scale)^T + (b1 + W1 @ shift)
        b1f = b1f + w1f @ shift               # uses the *unscaled* W1
        w1f = w1f * scale[None, :]
    # TODO(synk): training-mode BatchNorm (batch statistics + running-stat update)
    # has no clean single-kernel equivalent here and is not implemented.
    params = {
        "w1t": w1f.T.astype(compute_dtype),   # (E, O) in compute dtype
        "b1": b1f.reshape(1, O),              # f32 bias row
        "w2t": None,
        "b2": None,
    }
    if w2 is not None:
        w2 = jnp.reshape(w2, (w2.shape[0], -1))
        params["w2t"] = w2.astype(jnp.float32).T.astype(compute_dtype)   # (E, O)
        params["b2"] = b2.reshape(1, w2.shape[0]).astype(jnp.float32)
    return params


# ----------------------------- kernels ----------------------------------------

def _matmul_bias_kernel(x_ref, w_ref, b_ref, o_ref, *, apply_relu):
    """One (tm, E) x (E, tn) tile:  o = [relu](x @ W + b)   (f32 accumulation)."""
    y = jnp.dot(x_ref[...], w_ref[...], preferred_element_type=jnp.float32)
    y = y + b_ref[...]
    if apply_relu:
        y = jnp.maximum(y, 0.0)
    o_ref[...] = y.astype(o_ref.dtype)


def _fused_hidden_kernel(x_ref, w1_ref, b1_ref, w2_ref, b2_ref, o_ref):
    """One (tm, E) row tile:  o = relu(x @ W1 + b1) @ W2 + b2  (weights resident)."""
    h = jnp.dot(x_ref[...], w1_ref[...], preferred_element_type=jnp.float32)
    h = jnp.maximum(h + b1_ref[...], 0.0)
    y = jnp.dot(h.astype(w2_ref.dtype), w2_ref[...],
                preferred_element_type=jnp.float32)
    o_ref[...] = (y + b2_ref[...]).astype(o_ref.dtype)


# ----------------------------- launchers --------------------------------------

def _pick_tm(M, sub, tm_hint, tile_bytes_fn, budget, tm_start):
    tm = tm_start if tm_hint is None else max(sub, _round_up(tm_hint, sub))
    while tm > sub and tile_bytes_fn(tm) > budget:
        tm //= 2
    tm = max(sub, min(_round_up(tm, sub), _round_up(M, sub)))
    # >= 2 row tiles so both v7x TensorCores get work (parallel M axis); the
    # extra grid step is ~0.35 us, negligible on single-TC chips.
    if M > sub:
        tm = min(tm, _round_up(pl.cdiv(M, 2), sub))
    return tm


def _launch_matmul(x2d, wt, brow, *, apply_relu, tm_hint, vmem_limit, budget):
    """out = [relu](x2d @ wt + brow), tiled over rows (and over O only if needed)."""
    M, E = x2d.shape
    O = wt.shape[1]
    dtype = x2d.dtype
    it = jnp.dtype(dtype).itemsize
    sub = _sublane_multiple(dtype)

    # N tiling: keep the whole weight VMEM-resident (DMA'd once) whenever it fits.
    resident_w = 2 * (E * O * it + O * 4)          # double-buffered weight + bias
    if resident_w <= budget // 2 or O <= 512:
        tn, grid_n = O, 1
    else:
        tn = 512                                    # 256-aligned, lane-dense
        grid_n = pl.cdiv(O, tn)                     # partial last N tile is masked

    w_bytes = 2 * (E * tn * it + tn * 4)

    def tile_bytes(tm):
        return (2 * tm * E * it          # x tile (double-buffered)
                + 2 * tm * tn * it       # out tile (double-buffered)
                + tm * tn * 4            # f32 matmul intermediate (internal scratch)
                + w_bytes)

    tm = _pick_tm(M, sub, tm_hint, tile_bytes, budget, tm_start=1024)
    grid_m = pl.cdiv(M, tm)              # partial last row block is masked (no pad)

    kernel = functools.partial(_matmul_bias_kernel, apply_relu=apply_relu)

    if grid_n == 1:
        grid = (grid_m,)
        in_specs = [
            pl.BlockSpec((tm, E), lambda i: (i, 0)),   # x row tile
            pl.BlockSpec((E, O), lambda i: (0, 0)),    # weight, constant index
            pl.BlockSpec((1, O), lambda i: (0, 0)),    # bias, constant index
        ]
        out_specs = pl.BlockSpec((tm, O), lambda i: (i, 0))
        dims = ("parallel",)
    else:
        # TODO(synk): pl.Buffered(3) on the weight column tile (and Buffered(1) on
        # constant-index specs) could hide the re-streamed weight DMA / halve
        # resident weight bytes; kept on default buffering for robustness.
        grid = (grid_m, grid_n)
        in_specs = [
            pl.BlockSpec((tm, E), lambda i, j: (i, 0)),   # x tile (dedup'd over j)
            pl.BlockSpec((E, tn), lambda i, j: (0, j)),   # weight column tile
            pl.BlockSpec((1, tn), lambda i, j: (0, j)),   # bias column tile
        ]
        out_specs = pl.BlockSpec((tm, tn), lambda i, j: (i, j))
        dims = ("parallel", "parallel")

    return pl.pallas_call(
        kernel,
        out_shape=jax.ShapeDtypeStruct((M, O), dtype),
        grid_spec=pltpu.PrefetchScalarGridSpec(
            num_scalar_prefetch=0, grid=grid,
            in_specs=in_specs, out_specs=out_specs),
        compiler_params=pltpu.CompilerParams(
            dimension_semantics=dims, vmem_limit_bytes=vmem_limit),
    )(x2d, wt, brow)


def _launch_hidden_fused(x2d, w1t, b1, w2t, b2, *, tm_hint, vmem_limit, budget):
    """out = relu(x2d @ w1t + b1) @ w2t + b2, both weights VMEM-resident."""
    M, E = x2d.shape
    O = w1t.shape[1]
    dtype = x2d.dtype
    it = jnp.dtype(dtype).itemsize
    sub = _sublane_multiple(dtype)

    weight_bytes = 2 * ((E * O + O * O) * it + 2 * O * 4)

    def tile_bytes(tm):
        return (2 * tm * E * it          # x tile
                + 2 * tm * O * it        # out tile
                + 2 * tm * O * 4         # f32 pre-ReLU + f32 second-matmul result
                + tm * O * it            # recast copy of the hidden activation
                + weight_bytes)

    # Cap tm at 512 for the hidden path: two f32 intermediates per row tile.
    tm = _pick_tm(M, sub, tm_hint, tile_bytes, budget, tm_start=512)
    grid_m = pl.cdiv(M, tm)

    return pl.pallas_call(
        _fused_hidden_kernel,
        out_shape=jax.ShapeDtypeStruct((M, O), dtype),
        grid_spec=pltpu.PrefetchScalarGridSpec(
            num_scalar_prefetch=0, grid=(grid_m,),
            in_specs=[
                pl.BlockSpec((tm, E), lambda i: (i, 0)),   # x row tile
                pl.BlockSpec((E, O), lambda i: (0, 0)),    # W1^T (folded BN)
                pl.BlockSpec((1, O), lambda i: (0, 0)),    # b1'
                pl.BlockSpec((O, O), lambda i: (0, 0)),    # W2^T
                pl.BlockSpec((1, O), lambda i: (0, 0)),    # b2
            ],
            out_specs=pl.BlockSpec((tm, O), lambda i: (i, 0))),
        compiler_params=pltpu.CompilerParams(
            dimension_semantics=("parallel",),
            vmem_limit_bytes=vmem_limit),
    )(x2d, w1t, b1, w2t, b2)


# ----------------------------- public wrapper ----------------------------------

def transformer_pointwise(x, params, *, hidden=0, tm=None):
    """Pallas implementation of TransformerPointwise.forward (eval mode).

    x      : (B, S, E)
    params : output of fold_pointwise_params (hoist the fold out of the step!)
    returns (B, S, O)
    """
    B, S, E = x.shape
    w1t, b1 = params["w1t"], params["b1"]
    O = w1t.shape[1]
    use_hidden = hidden != 0
    M = B * S
    x2d = x.reshape(M, E)
    it = jnp.dtype(x.dtype).itemsize
    vmem_limit, budget = _vmem_budget()

    if not use_hidden:
        out = _launch_matmul(x2d, w1t, b1, apply_relu=False,
                             tm_hint=tm, vmem_limit=vmem_limit, budget=budget)
    else:
        w2t, b2 = params["w2t"], params["b2"]
        assert w2t is not None and b2 is not None
        # PyTorch module uses Conv1d(embedding, out) for lin2 -> requires O == E.
        assert O == E, "hidden path of TransformerPointwise requires out == embedding"
        fused_weight_bytes = 2 * ((E * O + O * O) * it + 2 * O * 4)
        if fused_weight_bytes <= budget // 2:
            out = _launch_hidden_fused(x2d, w1t, b1, w2t, b2,
                                       tm_hint=tm, vmem_limit=vmem_limit,
                                       budget=budget)
        else:
            # Very large E == O: resident weights would blow the VMEM budget
            # (e.g. v7x 64 MiB). Chain two N-tiled single-matmul kernels instead
            # (hidden activation round-trips HBM, each weight streams once per
            # row tile) rather than failing to compile or starving tm.
            # TODO(synk): fully fused K/N-tiled hidden kernel with f32 accumulator.
            h = _launch_matmul(x2d, w1t, b1, apply_relu=True,
                               tm_hint=tm, vmem_limit=vmem_limit, budget=budget)
            out = _launch_matmul(h, w2t, b2, apply_relu=False,
                                 tm_hint=tm, vmem_limit=vmem_limit, budget=budget)

    return out.reshape(B, S, O)


# ----------------------------- reference & test --------------------------------

def _reference(x, w1, b1, w2, b2, bn_scale, bn_shift, hidden):
    """Pure-JAX reference matching the PyTorch forward (eval-mode BN)."""
    h = x.astype(jnp.float32)
    if bn_scale is not None:
        h = h * bn_scale.reshape(1, 1, -1) + bn_shift.reshape(1, 1, -1)
    h = jnp.einsum("bse,oe->bso", h, w1.astype(jnp.float32)) + b1.reshape(1, 1, -1)
    if hidden != 0:
        h = jnp.maximum(h, 0.0)
        h = jnp.einsum("bse,oe->bso", h, w2.astype(jnp.float32)) + b2.reshape(1, 1, -1)
    return h.astype(x.dtype)


if __name__ == "__main__":
    # Small shapes: batch=2, seq=8, embedding=32, out=32
    B, S, E, O = 2, 8, 32, 32

    key = jax.random.PRNGKey(0)
    kx, k1, k2, k3, k4, k5, k6 = jax.random.split(key, 7)
    x = jax.random.normal(kx, (B, S, E), jnp.float32)

    # Conv1d(k=1) weights with the kernel dim squeezed
    w1 = jax.random.normal(k1, (O, E), jnp.float32) * 0.1
    b1 = jax.random.normal(k2, (O,), jnp.float32) * 0.1
    w2 = jax.random.normal(k3, (O, E), jnp.float32) * 0.1
    b2 = jax.random.normal(k4, (O,), jnp.float32) * 0.1

    # eval-mode BatchNorm1d(E): scale = gamma / sqrt(running_var + eps),
    # shift = beta - running_mean * scale
    eps = 1e-5
    gamma = 1.0 + 0.1 * jax.random.normal(k5, (E,), jnp.float32)
    beta = 0.1 * jax.random.normal(k6, (E,), jnp.float32)
    running_mean = jnp.zeros((E,), jnp.float32)
    running_var = jnp.ones((E,), jnp.float32)
    bn_scale = gamma / jnp.sqrt(running_var + eps)
    bn_shift = beta - running_mean * bn_scale

    # ---- fold/transpose weights ONCE (hoisted out of the per-step forward) ----
    p_simple = fold_pointwise_params(w1, b1)
    p_hidden = fold_pointwise_params(w1, b1, w2, b2,
                                     bn_scale=bn_scale, bn_shift=bn_shift)

    # Case 1: hidden=0, bn=False  (single 1x1 conv, no activation)
    y0 = jax.block_until_ready(transformer_pointwise(x, p_simple, hidden=0))
    r0 = _reference(x, w1, b1, None, None, None, None, 0)

    # Case 2: hidden!=0, bn=True (eval)  (BN -> conv -> ReLU -> conv), exact BN fold
    y1 = jax.block_until_ready(transformer_pointwise(x, p_hidden, hidden=16))
    r1 = _reference(x, w1, b1, w2, b2, bn_scale, bn_shift, 16)

    # Case 3: ragged row count (exercises the masked partial last row block)
    x3 = jax.random.normal(kx, (3, 5, E), jnp.float32)
    y2 = jax.block_until_ready(transformer_pointwise(x3, p_simple, hidden=0))
    r2 = _reference(x3, w1, b1, None, None, None, None, 0)

    # Case 4: bf16 operands (MXU bf16 inputs, f32 accumulation, sublane=16 rows)
    xb = x.astype(jnp.bfloat16)
    p_bf16 = fold_pointwise_params(w1, b1, compute_dtype=jnp.bfloat16)
    y3 = jax.block_until_ready(transformer_pointwise(xb, p_bf16, hidden=0))
    r3 = _reference(xb, w1, b1, None, None, None, None, 0)

    assert y0.shape == (B, S, O) and y1.shape == (B, S, O)
    assert y2.shape == (3, 5, O) and y3.shape == (B, S, O)
    assert jnp.allclose(y0, r0, atol=1e-4, rtol=1e-4)
    assert jnp.allclose(y1, r1, atol=1e-4, rtol=1e-4)   # BN fold is exact
    assert jnp.allclose(y2, r2, atol=1e-4, rtol=1e-4)
    # bf16 operands (weights cast to bf16) vs f32 reference: mixed-precision tolerance.
    assert jnp.allclose(y3.astype(jnp.float32), r3.astype(jnp.float32),
                        atol=5e-2, rtol=5e-2)
    print("KERNEL_OK")
</pallas_src>

<mosaic_0001>
module attributes {stable_mosaic.version = 11 : i64} {
  func.func @_matmul_bias_kernel(%arg0: i32, %arg1: memref<8x32xf32, #tpu.memory_space<vmem>>, %arg2: memref<32x32xf32, #tpu.memory_space<vmem>>, %arg3: memref<1x32xf32, #tpu.memory_space<vmem>>, %arg4: memref<8x32xf32, #tpu.memory_space<vmem>>) attributes {dimension_semantics = [#tpu.dimension_semantics<parallel>], iteration_bounds = array<i64: 2>, scalar_prefetch = 0 : i64, scratch_operands = 0 : i64, tpu.core_type = #tpu.core_type<tc>, window_params = [{transform_indices = @transform_0, window_bounds = array<i64: 8, 32>}, {pipeline_mode = #tpu.pipeline_mode<synchronous>, transform_indices = @transform_1, window_bounds = array<i64: 32, 32>}, {pipeline_mode = #tpu.pipeline_mode<synchronous>, transform_indices = @transform_2, window_bounds = array<i64: 1, 32>}, {transform_indices = @transform_3, window_bounds = array<i64: 8, 32>}]} {
    %c0 = arith.constant 0 : index
    %c0_0 = arith.constant 0 : index
    %0 = vector.load %arg1[%c0, %c0_0] : memref<8x32xf32, #tpu.memory_space<vmem>>, vector<8x32xf32>
    %c0_1 = arith.constant 0 : index
    %c0_2 = arith.constant 0 : index
    %1 = vector.load %arg2[%c0_1, %c0_2] : memref<32x32xf32, #tpu.memory_space<vmem>>, vector<32x32xf32>
    %cst = arith.constant dense<0.000000e+00> : vector<8x32xf32>
    %2 = tpu.matmul %0, %1, %cst {dimension_numbers = #tpu.dot_dimension_numbers<[1], [0], [0], [1], [0, 0, 1, 1], [], []>} : vector<8x32xf32>, vector<32x32xf32>, vector<8x32xf32> -> vector<8x32xf32>
    %c0_3 = arith.constant 0 : index
    %c0_4 = arith.constant 0 : index
    %3 = vector.load %arg3[%c0_3, %c0_4] : memref<1x32xf32, #tpu.memory_space<vmem>>, vector<1x32xf32>
    %4 = vector.broadcast %3 : vector<1x32xf32> to vector<8x32xf32>
    %5 = arith.addf %2, %4 : vector<8x32xf32>
    %c0_5 = arith.constant 0 : index
    %c0_6 = arith.constant 0 : index
    %6 = vector.load %arg4[%c0_5, %c0_6] : memref<8x32xf32, #tpu.memory_space<vmem>>, vector<8x32xf32>
    tpu.vector_store %arg4[%c0_5, %c0_6], %5 {strides = array<i32>} : memref<8x32xf32, #tpu.memory_space<vmem>>, vector<8x32xf32>,
    return
  }
  func.func @transform_0(%arg0: i32) -> (i32, i32) {
    %c0_i32 = arith.constant 0 : i32
    %c0_i32_0 = arith.constant 0 : i32
    return %arg0, %c0_i32 : i32, i32
  }
  func.func @transform_1(%arg0: i32) -> (i32, i32) {
    %c0_i32 = arith.constant 0 : i32
    %c0_i32_0 = arith.constant 0 : i32
    %c0_i32_1 = arith.constant 0 : i32
    return %c0_i32, %c0_i32_0 : i32, i32
  }
  func.func @transform_2(%arg0: i32) -> (i32, i32) {
    %c0_i32 = arith.constant 0 : i32
    %c0_i32_0 = arith.constant 0 : i32
    %c0_i32_1 = arith.constant 0 : i32
    return %c0_i32, %c0_i32_0 : i32, i32
  }
  func.func @transform_3(%arg0: i32) -> (i32, i32) {
    %c0_i32 = arith.constant 0 : i32
    %c0_i32_0 = arith.constant 0 : i32
    return %arg0, %c0_i32 : i32, i32
  }
}

</mosaic_0001>

<bundles_post_ra>
// kernel: tpu_custom_call.1
= control target key start
LH: loop header
LB: loop body
LE: loop exit
PB: predicated region body
PF: predicated region fallthrough
CT: control target
= control target key end

     0   :  { %8 = vsyncpa [#allocation3], 0  ;;  %s789_s0 = inlined_call_operand.hbm [shape: f32[16,32], index: 0, kind: input, shape index: {}]   ;;  %s790_s1 = inlined_call_operand.hbm [shape: f32[32,32], index: 1, kind: input, shape index: {}]   ;;  %s791_s2 = inlined_call_operand.vmem [shape: f32[1,32], index: 2, kind: input, shape index: {}]   ;;  %s792_s3 = inlined_call_operand.hbm [shape: f32[16,32], index: 3, kind: output, shape index: {}]  }
   0x1   :  { %10 = vsyncpa [#allocation3 + $0x1], 0 }
   0x2   :  { %11 = vsyncpa [#allocation6], 0 }
   0x3   :  { %12 = vsyncpa [#allocation4], 0 }
   0x4   :  { %14 = vsyncpa [#allocation4 + $0x1], 0  ;;  %s626_s12 = smov 0   ;;  %s628_s13 = smov 0  }
   0x5   :  { %s630_s14 = smov 0   ;;  %s632_s15 = smov 0  }
   0x6 LB: > { %s647_s16 = sadd.s32 4294967295, %s597_s15   ;;  %s382_s17 = sadd.s32 4294967294, %s597_s15   ;;  %s597_s15 = sphi %s632_s15, %s814_s15   ;;  %s593_s14 = sphi %s630_s14, %s813_s14   ;;  %s589_s13 = sphi %s628_s13, %s812_s13   ;;  %s585_s12 = sphi %s626_s12, %s811_s12  }
   0x7   : > { %p40_p0 = scmp.ne.s32.totalorder %s589_s13, %s585_s12  ;;  %p793_p1 = scmp.eq.s32.totalorder %s647_s16, 0 }
   0x8   : > { %p112_p3 = scmp.eq.s32.totalorder %s382_s17, 1  ;;  %p383_p5 = scmp.ge.s32.totalorder %s597_s15, 1 }
   0x9   : > { %p656_p4 = por %p793_p1, %p40_p0  ;;  %p119_p7 = scmp.lt.s32.totalorder %s597_s15, 3 }
   0xa   : > { %p661_p6 = por %p112_p3, %p40_p0  ;;  %s599_s21 = smov [#allocation5]  }
   0xb   : > { %s797_s18 = scalar_select %p656_p4, 1, 0 }
   0xc   : > { %s798_s19 = scalar_select %p661_p6, 1, 0 }
   0xd   : > { %p666_p8 = pnand %p383_p5, %p119_p7  ;;  %s131_s22 = sshll.u32 %s599_s21, 4  ;;  %s132_s22 = int_to_ptr.vmem [resolvable:$true] %s131_s22 }
   0xe   : > { %s680_s24 = sadd.s32 1, %s597_s15   ;;  %s27_s25 = sadd.s32 1, %s593_s14 }
   0xf   : > { %s799_s20 = scalar_select %p666_p8, 1, 0 }
  0x10   : > { %p422_p9 = pneg %p666_p8  ;;  %s24_s26 = ssub.s32 %s597_s15, %s680_s24 }
  0x11   : > { %s486_s27 = scalar_lea.vmem %s132_s22, 512  ;;  %p494_p5 = scmp.lt.s32.totalorder %s132_s22, %s132_s22 }
  0x12   : > { %p675_p11 = pnand %p422_p9, %p793_p1  ;;  %p487_p13 = scmp.ne.s32.totalorder %s132_s22, %s486_s27 }
  0x13   : > { %p495_p7 = scmp.lt.s32.totalorder %s486_s27, %s486_s27 }
  0x14   : > { %p477_p12 = pneg %p675_p11 }
  0x15   : > { %p496_p10 = por %p495_p7, %p494_p5 }
  0x16   : > { %p489_p0 = pnand %p487_p13, %p477_p12 }
  0x18   : > { %p490_p3 = pneg %p489_p0 }
  0x1a   : > { %p497_p2 = pnand %p496_p10, %p490_p3 }
  0x1c   : > { %500 = shalt.err (!%p497_p2)
}
  0x1d   : > { %s600_s28 = smov 128   ;;  %s601_s29 = smov 8  }
  0x1e   : > { %425 = dma.hbm_to_vmem [thread:$0]  (!%p675_p11), %s790_s1, 512, %s132_s22, [#allocation6], %s600_s28, %s600_s28, %s601_s29  }
  0x1f   : > { %p25_p9 = scmp.eq.s32.totalorder %s24_s26, 0  ;;  %p34_p12 = scmp.ne.s32.totalorder %s593_s14, %s589_s13 }
  0x20   : > { %p35_p10 = scmp.eq.s32.totalorder %s597_s15, 0  ;;  %p435_p2 = scmp.lt.s32.totalorder %s597_s15, 2 }
  0x21   : > { %s697_s5 = scalar_select %p25_p9, %s593_s14, %s27_s25  }
  0x22   : > { %p36_p13 = por %p35_p10, %p34_p12  ;;  %p801_p0 = scmp.eq.s32.totalorder %s647_s16, 1 }
  0x23   : > { %s148_s7 = sand.u32 1, %s593_s14   ;;  %s387_s8 = sshll.u32 %s597_s15, 7 }
  0x24   : > { %p701_p3 = por %p801_p0, %p34_p12  ;;  %s386_s9 = sshll.u32 %s148_s7, 3 }
  0x25   : > { %s710_s17 = scalar_lea.hbm %s789_s0, %s387_s8  ;;  %s152_s21 = scalar_lea.vmem [#allocation2], %s386_s9 }
  0x26   : > { %s802_s6 = scalar_select %p701_p3, 1, 0 }
  0x27   : > { %s159_s22 = sshll.u32 %s152_s21, 4  ;;  %p712_p11 = pnand %p435_p2, %p36_p13  ;;  %s160_s22 = int_to_ptr.vmem [resolvable:$true] %s159_s22 }
  0x28   : > { %s149_s25 = scalar_lea.sflag [#allocation3], %s148_s7  ;;  %s501_s26 = scalar_lea.hbm %s710_s17, 128 }
  0x29   : > { %p502_p5 = scmp.ne.s32.totalorder %s710_s17, %s501_s26  ;;  %p503_p7 = pneg %p712_p11 }
  0x2a   : > { %s506_s29 = scalar_lea.hbm %s789_s0, 256  ;;  %p507_p10 = scmp.lt.s32.totalorder %s710_s17, %s789_s0 }
  0x2b   : > { %p504_p9 = pnand %p503_p7, %p502_p5  ;;  %p508_p2 = scmp.lt.s32.totalorder %s506_s29, %s501_s26 }
  0x2d   : > { %p505_p12 = pneg %p504_p9  ;;  %p509_p13 = por %p508_p2, %p507_p10 }
  0x2f   : > { %p510_p0 = pnand %p509_p13, %p505_p12 }
  0x31   : > { %513 = shalt.err (!%p510_p0)
}
  0x32   : > { %s514_s8 = scalar_lea.vmem %s160_s22, 128  ;;  %s602_s7 = smov [#allocation2]  }
  0x33   : > { %p515_p1 = scmp.ne.s32.totalorder %s160_s22, %s514_s8  ;;  %s519_s9 = sshll.u32 %s602_s7, 4  ;;  %s520_s9 = int_to_ptr.vmem [resolvable:$false] %s519_s9 }
  0x34   : > { %s521_s10 = scalar_lea.vmem %s520_s9, 256  ;;  %p522_p5 = scmp.lt.s32.totalorder %s160_s22, %s520_s9 }
  0x35   : > { %p517_p6 = pnand %p515_p1, %p503_p7  ;;  %p523_p9 = scmp.lt.s32.totalorder %s521_s10, %s514_s8 }
  0x37   : > { %p518_p3 = pneg %p517_p6  ;;  %p524_p4 = por %p523_p9, %p522_p5 }
  0x39   : > { %p525_p8 = pnand %p524_p4, %p518_p3 }
  0x3b   : > { %528 = shalt.err (!%p525_p8)
}
  0x3c   : > { %429 = dma.hbm_to_vmem [thread:$0]  (!%p712_p11), %s710_s17, 128, %s160_s22, %s149_s25  }
  0x3d   : > { %p804_p12 = scmp.ne.s32.totalorder %s799_s20, 0 }
  0x3e   : > { %s733_s11 = sand.u32 (!%p804_p12), 1, %s589_s13   ;;  %p805_p1 = scmp.ne.s32.totalorder (!%p804_p12), %s797_s18, 0 }
  0x3f   : > { %168 = sbr.rel (%p804_p12) target bundleno = 289 (0x121), region = 32  ;;  %s389_s21 = sshll.u32 (!%p804_p12), %s733_s11, 3 }
  0x40   : > { %s171_s26 = scalar_lea.sflag (!%p804_p12), [#allocation3], %s733_s11  ;;  %s174_s27 = scalar_lea.vmem (!%p804_p12), [#allocation2], %s389_s21 }
  0x44   : > { %572 = dma.done.wait (%p805_p1), %s171_s26, 128  }
  0x45   : > { %574 = vsyncadd (%p805_p1), %s171_s26, 4294967168  ;;  %p806_p4 = scmp.eq.s32.totalorder %s647_s16, 0 }
  0x47   : > { %576 = dma.done.wait (%p806_p4), [#allocation6], 512   ;;  %p807_p6 = pmov %p806_p4 }
  0x48   : > { %v603_v0 = vmov 0.0   ;;  %vm604_vm0 = vmmov 0   ;;  %v205_v1 = vld [vmem:[#allocation5 + $0x18] sm:$0xff]  ;;  %v204_v2 = vld [vmem:[#allocation5 + $0x10] sm:$0xff]  ;;  %v203_v3 = vld [vmem:[#allocation5 + $0x8] sm:$0xff]  ;;  %vm213_vm1 = vcmask 261120  }
  0x49   : > { %578 = vsyncadd (%p807_p6), [#allocation6], 4294966784  ;;  %403 = vmatprep.subr.mxu0 %v603_v0  ;;  %411 = vmatprep.mubr.msk.f32.mxu0 %vm604_vm0, %v603_v0  ;;  %v202_v4 = vld [vmem:[#allocation5] sm:$0xff]  ;;  %v201_v5 = vld [vmem:[%s174_s27] sm:$0xff]  ;;  %s395_s17 = sshll.u32 %s647_s16, 7  ;;  %s200_s22 = scalar_lea.vmem [#allocation7], %s389_s21 }
  0x4a   : > { %404 = vmatpush3.msra.mxu0 %v205_v1  ;;  %v392_v6 = vld [vmem:[%s791_s2] ss:$0 sm:$0xff]  ;;  %s302_s23 = sshll.u32 %s200_s22, 4  ;;  %s752_s29 = scalar_lea.hbm %s792_s3, %s395_s17  ;;  %s303_s23 = int_to_ptr.vmem [resolvable:$true] %s302_s23 }
  0x4b   : > { %405 = vmatprep.subr.mxu0 %v603_v0  ;;  %s289_s30 = scalar_lea.sflag [#allocation4], %s733_s11  ;;  %s529_s4 = scalar_lea.vmem %s303_s23, 128 }
  0x4c   : > { %406 = vmatpush3.msra.mxu0 %v204_v2  ;;  %p530_p8 = scmp.ne.s32.totalorder %s303_s23, %s529_s4  ;;  %p808_p3 = scmp.ne.s32.totalorder %s802_s6, 0 }
  0x4d   : > { %407 = vmatprep.subr.mxu0 %v603_v0  ;;  %s605_s8 = smov [#allocation7]  }
  0x4e   : > { %408 = vmatpush3.msra.mxu0 %v203_v3  ;;  %p531_p11 = pnand %p530_p8, %p808_p3  ;;  %s533_s16 = sshll.u32 %s605_s8, 4  ;;  %s534_s16 = int_to_ptr.vmem [resolvable:$false] %s533_s16 }
  0x4f   : > { %409 = vmatprep.subr.mxu0 %v603_v0  ;;  %s535_s7 = scalar_lea.vmem %s534_s16, 256  ;;  %p536_p10 = scmp.lt.s32.totalorder %s303_s23, %s534_s16 }
  0x50   : > { %410 = vmatpush3.msra.mxu0 %v202_v4  ;;  %p532_p7 = pneg %p531_p11  ;;  %p537_p2 = scmp.lt.s32.totalorder %s535_s7, %s529_s4 }
  0x51   : > { %412 = vmatmul.mubr.msk.f32.vlgmr.msra.gmra.mxu0 %vm213_vm1, %v201_v5 }
  0x52   : > { %p538_p13 = por %p537_p2, %p536_p10 }
  0x54   : > { %p539_p0 = pnand %p538_p13, %p532_p7 }
 0x111   : > { %v283_v7 = vpop.f32.mrf.mxu0 }
 0x112   : > { %v284_v8 = vadd.f32 %v392_v6, %v283_v7 }
 0x113   : > { %v413_v9 = vpop.f32.mrf.mxu0 }
 0x114   : > { %287 = vst.msk [vmem:[%s200_s22] sm:$0xff] %vm213_vm1, %v284_v8 }
 0x115   : > { %542 = shalt.err (!%p539_p0)
}
 0x116   : > { %s543_s9 = scalar_lea.hbm %s752_s29, 128  ;;  %s547_s21 = scalar_lea.hbm %s792_s3, 256 }
 0x117   : > { %p544_p5 = scmp.ne.s32.totalorder %s752_s29, %s543_s9  ;;  %p548_p1 = scmp.lt.s32.totalorder %s752_s29, %s792_s3 }
 0x118   : > { %p549_p4 = scmp.lt.s32.totalorder %s547_s21, %s543_s9 }
 0x119   : > { %p545_p9 = pnand %p544_p5, %p808_p3 }
 0x11a   : > { %p550_p6 = por %p549_p4, %p548_p1 }
 0x11b   : > { %p546_p12 = pneg %p545_p9 }
 0x11d   : > { %p551_p8 = pnand %p550_p6, %p546_p12 }
 0x11f   : > { %554 = shalt.err (!%p551_p8)
}
 0x120   : > { %420 = dma.vmem_to_hbm [thread:$0]  (%p808_p3), %s303_s23, 128, %s752_s29, %s289_s30  }
 0x121 PF: > { %s314_s18 = sand.u32 1, %s585_s12   ;;  %p809_p11 = scmp.ne.s32.totalorder %s798_s19, 0 }
 0x122   : > { %p810_p7 = scmp.ge.s32.totalorder %s597_s15, 2  ;;  %s315_s20 = scalar_lea.sflag [#allocation4], %s314_s18 }
 0x124   : > { %p431_p10 = pnand %p810_p7, %p809_p11 }
 0x126   : > { %p432_p2 = pneg %p431_p10 }
 0x128   : > { %580 = dma.done.wait (%p432_p2), %s315_s20, 128  }
 0x129   : > { %582 = vsyncadd (%p432_p2), %s315_s20, 4294967168  ;;  %p17_p13 = scmp.ge.s32.totalorder %s680_s24, 4   ;;  %s811_s12 = smov %s589_s13 }
 0x12a   : > { %s812_s13 = smov %s593_s14  ;;  %s813_s14 = smov %s697_s5 }
 0x12b   : > { %s814_s15 = smov %s680_s24  ;;  %19 = sbr.rel (!%p17_p13) target bundleno = 6 (0x6), region = 81 }
 0x130   :  { %320 = vsyncpa [#allocation3], 1 }
 0x131   :  { %322 = vsyncpa [#allocation3 + $0x1], 1 }
 0x132   :  { %323 = vsyncpa [#allocation6], 1 }
 0x133   :  { %324 = vsyncpa [#allocation4], 1 }
 0x134   :  { %326 = vsyncpa [#allocation4 + $0x1], 1 }

</bundles_post_ra>
